<compile_context>
chip_gen: v7x
topology: tpu7x:2x2x1
jax: 0.10.0
libtpu: 0.0.40
codegen_flags: <defaults>
</compile_context>

<pallas_src>
import jax
import jax.numpy as jnp
from jax.experimental import pallas as pl
from jax.experimental.pallas import tpu as pltpu

_MIB = 1024 * 1024


def _round_up(x, m):
    return ((x + m - 1) // m) * m


def _cdiv(a, b):
    return (a + b - 1) // b


def _physical_vmem_bytes():
    try:
        info = pltpu.get_tpu_info()
        v = getattr(info, "vmem_capacity_bytes", None)
        if v:
            return int(v)
    except Exception:
        pass
    return 128 * _MIB  # v5e / v6e default


def _linear_sigmoid_kernel(x_ref, w_ref, b_ref, out_ref):
    # x_ref : (tb, feat)  natural layout: batch rows on sublanes, features on lanes
    # w_ref : (1, feat)   weight row (sublane-broadcast by the VPU multiply)
    # b_ref : (1, 1)      bias scalar in SMEM
    # out_ref: (2, tb)    row 0 = logits, row 1 = sigmoid(logits)  (lane-dense)
    x = x_ref[...].astype(jnp.float32)
    w = w_ref[...].astype(jnp.float32)
    col = jnp.sum(x * w, axis=1, keepdims=True)        # (tb, 1)  XLU lane reduce
    row = jnp.transpose(col) + b_ref[0, 0]             # (1, tb)  XLU transpose -> lane-dense
    out_ref[0:1, :] = row.astype(out_ref.dtype)
    out_ref[1:2, :] = jax.nn.sigmoid(row).astype(out_ref.dtype)


def sklearn_style_forward(x, w, b, *, max_batch_tile=32768):
    """Binary linear classifier forward.

    x: (batch, feat) in its stored dtype (f32 or bf16; no wrapper-side cast),
    w: (feat, 1), b: scalar / (1,).
    Returns (logits, probabilities), each shaped [batch, 1], float32.
    """
    batch, feat = x.shape
    assert w.shape == (feat, 1)
    itemsize = jnp.dtype(x.dtype).itemsize

    # ---- Generation-gated VMEM budget (v7x has only 64 MiB physical VMEM). ----
    phys_vmem = _physical_vmem_bytes()
    budget = 40 * _MIB if phys_vmem <= 80 * _MIB else 64 * _MIB

    # ---- VMEM accounting per batch row of one tile:
    #   * input block lane dim pads to 128 in VMEM (HBM traffic stays unpadded),
    #   * f32 product intermediate materialized by the kernel body,
    #   * (2, tb) f32 output block pads to 8 sublanes; all double-buffered.
    lanes = _round_up(feat, 128)
    per_row = (2 * lanes * itemsize     # double-buffered input block
               + lanes * 4              # f32 in-kernel product intermediate
               + 2 * 8 * 4)             # double-buffered (2, tb) output block
    fixed = 256 * 1024                  # weight block, scalars, slack

    if batch <= 128:
        tb = batch                      # single tile, full-extent block specs
    else:
        cap = max(128, ((int(budget * 0.85) - fixed) // per_row) // 128 * 128)
        tb = min(cap, max_batch_tile, _round_up(batch, 128))
        if tb >= batch:
            # Keep >= 2 grid steps: overlaps DMA/compute and feeds both
            # TensorCores on v7x instead of collapsing to a single step.
            tb = max(128, _round_up(_cdiv(batch, 2), 128))
    n_tiles = _cdiv(batch, tb)

    est_vmem = tb * per_row + fixed
    vmem_limit = int(min(max(budget, est_vmem * 5 // 4), phys_vmem - 16 * _MIB))
    # TODO(synk): for very large feat (>~8-16K f32) add a feature (K) reduction
    # grid axis ("arbitrary") with an f32 VMEM accumulator + pl.when epilogue
    # instead of relying on a raised vmem_limit.

    w_row = jnp.reshape(w, (1, feat))                    # tiny host op
    b2d = jnp.asarray(b, jnp.float32).reshape(1, 1)

    out = pl.pallas_call(
        _linear_sigmoid_kernel,
        out_shape=jax.ShapeDtypeStruct((2, batch), jnp.float32),
        grid_spec=pltpu.PrefetchScalarGridSpec(
            num_scalar_prefetch=0,
            grid=(n_tiles,),
            in_specs=[
                pl.BlockSpec((tb, feat), lambda i: (i, 0)),          # X tile, natural layout
                pl.BlockSpec((1, feat), lambda i: (0, 0)),           # weight row (stays resident)
                pl.BlockSpec(memory_space=pltpu.MemorySpace.SMEM),   # bias scalar
            ],
            out_specs=pl.BlockSpec((2, tb), lambda i: (0, i)),       # lane-dense combined output
        ),
        compiler_params=pltpu.CompilerParams(
            dimension_semantics=("parallel",),   # shards batch tiles across TCs on v7x
            vmem_limit_bytes=vmem_limit,
        ),
    )(x, w_row, b2d)

    logits = out[0, :].reshape(batch, 1)
    probas = out[1, :].reshape(batch, 1)
    return logits, probas


if __name__ == "__main__":
    key = jax.random.PRNGKey(0)
    kx, kw, kb = jax.random.split(key, 3)

    # Small primary shapes consistent with a sklearn-style tabular classifier.
    batch, feat = 8, 32
    x = jax.random.normal(kx, (batch, feat), dtype=jnp.float32)
    w = jax.random.normal(kw, (feat, 1), dtype=jnp.float32) * 0.1
    b = jax.random.normal(kb, (1,), dtype=jnp.float32) * 0.1

    # f32 path (single tile)
    logits, probas = sklearn_style_forward(x, w, b)
    jax.block_until_ready((logits, probas))
    ref_logits = x @ w + b
    ref_probas = jax.nn.sigmoid(ref_logits)
    assert jnp.allclose(logits, ref_logits, atol=1e-5, rtol=1e-5)
    assert jnp.allclose(probas, ref_probas, atol=1e-5, rtol=1e-5)

    # Multi-tile / ragged-edge path (2 grid steps, last block partially valid)
    batch2 = 200
    x2 = jax.random.normal(kx, (batch2, feat), dtype=jnp.float32)
    logits2, probas2 = sklearn_style_forward(x2, w, b, max_batch_tile=128)
    jax.block_until_ready((logits2, probas2))
    ref2 = x2 @ w + b
    assert jnp.allclose(logits2, ref2, atol=1e-5, rtol=1e-5)
    assert jnp.allclose(probas2, jax.nn.sigmoid(ref2), atol=1e-5, rtol=1e-5)

    # bf16 pass-through (only when the caller's data already lives in bf16;
    # compute/accumulation stays f32 in-kernel)
    xb = x.astype(jnp.bfloat16)
    wb = w.astype(jnp.bfloat16)
    logits16, probas16 = sklearn_style_forward(xb, wb, b)
    jax.block_until_ready((logits16, probas16))
    ref16 = xb.astype(jnp.float32) @ wb.astype(jnp.float32) + b
    assert jnp.allclose(logits16, ref16, atol=1e-4, rtol=1e-4)
    assert jnp.allclose(probas16, jax.nn.sigmoid(ref16), atol=1e-4, rtol=1e-4)

    print("KERNEL_OK")
</pallas_src>

<mosaic_0001>
module attributes {stable_mosaic.version = 11 : i64} {
  func.func @_linear_sigmoid_kernel(%arg0: i32, %arg1: memref<8x32xf32, #tpu.memory_space<vmem>>, %arg2: memref<1x32xf32, #tpu.memory_space<vmem>>, %arg3: memref<1x1xf32, #tpu.memory_space<smem>>, %arg4: memref<2x8xf32, #tpu.memory_space<vmem>>) attributes {dimension_semantics = [#tpu.dimension_semantics<parallel>], iteration_bounds = array<i64: 1>, scalar_prefetch = 0 : i64, scratch_operands = 0 : i64, tpu.core_type = #tpu.core_type<tc>, window_params = [{transform_indices = @transform_0, window_bounds = array<i64: 8, 32>}, {pipeline_mode = #tpu.pipeline_mode<synchronous>, transform_indices = @transform_1, window_bounds = array<i64: 1, 32>}, {transform_indices = @transform_2, window_bounds = array<i64: 1, 1>}, {transform_indices = @transform_3, window_bounds = array<i64: 2, 8>}]} {
    %c0 = arith.constant 0 : index
    %c0_0 = arith.constant 0 : index
    %0 = vector.load %arg1[%c0, %c0_0] : memref<8x32xf32, #tpu.memory_space<vmem>>, vector<8x32xf32>
    %c0_1 = arith.constant 0 : index
    %c0_2 = arith.constant 0 : index
    %1 = vector.load %arg2[%c0_1, %c0_2] : memref<1x32xf32, #tpu.memory_space<vmem>>, vector<1x32xf32>
    %2 = vector.broadcast %1 : vector<1x32xf32> to vector<8x32xf32>
    %3 = arith.mulf %0, %2 : vector<8x32xf32>
    %cst = arith.constant dense<0.000000e+00> : vector<8xf32>
    %4 = vector.multi_reduction <add>, %3, %cst [1] : vector<8x32xf32> to vector<8xf32>
    %5 = vector.shape_cast %4 : vector<8xf32> to vector<8x1xf32>
    %6 = tpu.transpose %5, [1, 0] : vector<8x1xf32> -> vector<1x8xf32>
    %c0_3 = arith.constant 0 : index
    %c0_4 = arith.constant 0 : index
    %7 = memref.load %arg3[%c0_3, %c0_4] : memref<1x1xf32, #tpu.memory_space<smem>>
    %8 = vector.broadcast %7 : f32 to vector<1x8xf32>
    %9 = arith.addf %6, %8 : vector<1x8xf32>
    %c0_5 = arith.constant 0 : index
    %c0_6 = arith.constant 0 : index
    %10 = vector.load %arg4[%c0_5, %c0_6] : memref<2x8xf32, #tpu.memory_space<vmem>>, vector<1x8xf32>
    tpu.vector_store %arg4[%c0_5, %c0_6], %9 {strides = array<i32>} : memref<2x8xf32, #tpu.memory_space<vmem>>, vector<1x8xf32>,
    %11 = arith.negf %9 : vector<1x8xf32>
    %12 = math.exp %11 : vector<1x8xf32>
    %cst_7 = arith.constant 1.000000e+00 : f32
    %13 = vector.broadcast %cst_7 : f32 to vector<1x8xf32>
    %14 = arith.addf %13, %12 : vector<1x8xf32>
    %15 = arith.divf %13, %14 : vector<1x8xf32>
    %c1 = arith.constant 1 : index
    %c0_8 = arith.constant 0 : index
    %16 = vector.load %arg4[%c1, %c0_8] : memref<2x8xf32, #tpu.memory_space<vmem>>, vector<1x8xf32>
    tpu.vector_store %arg4[%c1, %c0_8], %15 {strides = array<i32>} : memref<2x8xf32, #tpu.memory_space<vmem>>, vector<1x8xf32>,
    return
  }
  func.func @transform_0(%arg0: i32) -> (i32, i32) {
    %c0_i32 = arith.constant 0 : i32
    %c0_i32_0 = arith.constant 0 : i32
    return %arg0, %c0_i32 : i32, i32
  }
  func.func @transform_1(%arg0: i32) -> (i32, i32) {
    %c0_i32 = arith.constant 0 : i32
    %c0_i32_0 = arith.constant 0 : i32
    %c0_i32_1 = arith.constant 0 : i32
    return %c0_i32, %c0_i32_0 : i32, i32
  }
  func.func @transform_2(%arg0: i32) -> (i32, i32) {
    %c0_i32 = arith.constant 0 : i32
    %c0_i32_0 = arith.constant 0 : i32
    %c0_i32_1 = arith.constant 0 : i32
    return %c0_i32, %c0_i32_0 : i32, i32
  }
  func.func @transform_3(%arg0: i32) -> (i32, i32) {
    %c0_i32 = arith.constant 0 : i32
    %c0_i32_0 = arith.constant 0 : i32
    return %c0_i32, %arg0 : i32, i32
  }
}

</mosaic_0001>

<bundles_post_ra>
// kernel: tpu_custom_call.1
= control target key start
LH: loop header
LB: loop body
LE: loop exit
PB: predicated region body
PF: predicated region fallthrough
CT: control target
= control target key end

     0   :  { %9 = vsyncpa [#allocation4], 0  ;;  %s257_s0 = inlined_call_operand.hbm [shape: f32[8,32], index: 0, kind: input, shape index: {}]   ;;  %s258_s1 = inlined_call_operand.hbm [shape: f32[1,32], index: 1, kind: input, shape index: {}]   ;;  %s259_s2 = inlined_call_operand.<no memory space> [shape: f32[1,1], index: 2, kind: input, shape index: {}]   ;;  %s260_s3 = inlined_call_operand.hbm [shape: f32[2,8], index: 3, kind: output, shape index: {}]  }
   0x1   :  { %10 = vsyncpa [#allocation7], 0 }
   0x2   :  { %11 = vsyncpa [#allocation5], 0  ;;  %s195_s12 = smov [#allocation3]   ;;  %s196_s14 = smov [#allocation6]  }
   0x3   :  { %s18_s13 = sshll.u32 %s195_s12, 4  ;;  %s28_s15 = sshll.u32 %s196_s14, 4  ;;  %s19_s13 = int_to_ptr.vmem [resolvable:$true] %s18_s13  ;;  %s29_s15 = int_to_ptr.vmem [resolvable:$true] %s28_s15 }
   0x4   :  { %s123_s18 = scalar_lea.hbm %s257_s0, 128 }
   0x5   :  { %p124_p0 = scmp.ne.s32.totalorder %s257_s0, %s123_s18  ;;  %p127_p1 = scmp.lt.u32.totalorder %s123_s18, %s257_s0 }
   0x7   :  { %p129_p2 = pnand %p127_p1, %p124_p0 }
   0x9   :  { %132 = shalt.err (!%p129_p2)
}
   0xa   :  { %s133_s23 = scalar_lea.vmem %s19_s13, 128  ;;  %p138_p4 = scmp.lt.s32.totalorder %s19_s13, %s19_s13 }
   0xb   :  { %p134_p3 = scmp.ne.s32.totalorder %s19_s13, %s133_s23  ;;  %p139_p5 = scmp.lt.s32.totalorder %s133_s23, %s133_s23 }
   0xd   :  { %p140_p6 = por %p139_p5, %p138_p4 }
   0xf   :  { %p141_p7 = pnand %p140_p6, %p134_p3 }
  0x11   :  { %144 = shalt.err (!%p141_p7)
}
  0x12   :  { %21 = dma.hbm_to_vmem [thread:$0]  %s257_s0, 128, %s19_s13, [#allocation4]  }
  0x13   :  { %s145_s28 = scalar_lea.hbm %s258_s1, 16 }
  0x14   :  { %p146_p8 = scmp.ne.s32.totalorder %s258_s1, %s145_s28  ;;  %p149_p9 = scmp.lt.u32.totalorder %s145_s28, %s258_s1 }
  0x16   :  { %p151_p10 = pnand %p149_p9, %p146_p8 }
  0x18   :  { %154 = shalt.err (!%p151_p10)
}
  0x19   :  { %s155_s6 = scalar_lea.vmem %s29_s15, 16  ;;  %s159_s7 = scalar_lea.vmem %s29_s15, 32 }
  0x1a   :  { %p156_p11 = scmp.ne.s32.totalorder %s29_s15, %s155_s6  ;;  %p160_p12 = scmp.lt.s32.totalorder %s29_s15, %s29_s15 }
  0x1b   :  { %p161_p13 = scmp.lt.s32.totalorder %s159_s7, %s155_s6 }
  0x1d   :  { %p162_p0 = por %p161_p13, %p160_p12 }
  0x1f   :  { %p163_p1 = pnand %p162_p0, %p156_p11 }
  0x21   :  { %166 = shalt.err (!%p163_p1)
}
  0x22   :  { %31 = dma.hbm_to_vmem [thread:$0]  %s258_s1, 16, %s29_s15, [#allocation7]  }
  0x23   :  { %189 = dma.done.wait [#allocation4], 128  }
  0x24   :  { %190 = vsyncadd [#allocation4], 4294967168 }
  0x25   :  { %191 = dma.done.wait [#allocation7], 16  }
  0x26   :  { %192 = vsyncadd [#allocation7], 4294967280  ;;  %v40_v0 = vld [vmem:[#allocation3] sm:$0xff]  ;;  %v113_v1 = vld [vmem:[#allocation6] ss:$0 sm:$0xff]  ;;  %vm49_vm0 = vcmask 261120   ;;  %v86_v5 = vstv %s259_s2 }
  0x27   :  { %v48_v2 = vmul.f32 %v113_v1, %v40_v0  ;;  %vm88_vm1 = vcmask 57344   ;;  %s197_s1 = smov [#allocation8]  }
  0x28   :  { %s103_s11 = sshll.u32 %s197_s1, 4  ;;  %s104_s11 = int_to_ptr.vmem [resolvable:$true] %s103_s11 }
  0x29   :  { %v50_v3 = vsel %vm49_vm0, %v48_v2, 0.0  ;;  %s167_s12 = scalar_lea.vmem %s104_s11, 32  ;;  %p172_p3 = scmp.lt.s32.totalorder %s104_s11, %s104_s11 }
  0x2a   :  { %51 = vadd.xlane.f32.xlu0 %v50_v3  ;;  %p168_p2 = scmp.ne.s32.totalorder %s104_s11, %s167_s12  ;;  %p173_p4 = scmp.lt.s32.totalorder %s167_s12, %s167_s12 }
  0x2c   :  { %p174_p5 = por %p173_p4, %p172_p3 }
  0x2e   :  { %p175_p6 = pnand %p174_p5, %p168_p2 }
  0xb7   :  { %v52_v4 = vpop.xlane.xlu0 %51 }
  0xb8   :  { %53 = vxpose.xlu0.b32.start.end [1/1] (short) (narrow) %v52_v4, 8 }
 0x138   :  { %v69_v6 = vpop.trf.xlu0 }
 0x139   :  { %v87_v7 = vadd.f32 %v86_v5, %v69_v6 }
 0x13b   :  { %v114_v8 = vmul.f32 -1.442695, %v87_v7  ;;  %89 = vst.msk [vmem:[#allocation8] sm:$0x1] %vm88_vm1, %v87_v7 }
 0x13d   :  { %119 = vpow2.f32 %v114_v8 }
 0x147   :  { %v120_v9 = vpop.eup %119 }
 0x148   :  { %v93_v10 = vadd.f32 1.0, %v120_v9 }
 0x14a   :  { %121 = vrcp.f32 %v93_v10 }
 0x154   :  { %v122_v11 = vpop.eup %121 }
 0x155   :  { %96 = vst.msk [vmem:[#allocation8 + $0x1] sm:$0x1] %vm88_vm1, %v122_v11 }
 0x156   :  { %178 = shalt.err (!%p175_p6)
}
 0x157   :  { %s179_s14 = scalar_lea.hbm %s260_s3, 32 }
 0x158   :  { %p180_p7 = scmp.ne.s32.totalorder %s260_s3, %s179_s14  ;;  %p183_p8 = scmp.lt.u32.totalorder %s179_s14, %s260_s3 }
 0x15a   :  { %p185_p9 = pnand %p183_p8, %p180_p7 }
 0x15c   :  { %188 = shalt.err (!%p185_p9)
}
 0x15d   :  { %106 = dma.vmem_to_hbm [thread:$0]  %s104_s11, 32, %s260_s3, [#allocation5]  }
 0x15e   :  { %193 = dma.done.wait [#allocation5], 32  }
 0x15f   :  { %194 = vsyncadd [#allocation5], 4294967264 }
 0x160   :  { %110 = vsyncpa [#allocation4], 1 }
 0x161   :  { %111 = vsyncpa [#allocation7], 1 }
 0x162   :  { %112 = vsyncpa [#allocation5], 1 }

</bundles_post_ra>
